<compile_context>
chip_gen: v7x
topology: tpu7x:2x2x1
jax: 0.10.0
libtpu: 0.0.40
codegen_flags: <defaults>
</compile_context>

<pallas_src>
import functools

import jax
import jax.numpy as jnp
from jax.experimental import pallas as pl
from jax.experimental.pallas import tpu as pltpu


def _root_kernel(*refs, n_children, residual):
    # refs = (x_0, ..., x_{k-1}, w_0, ..., w_{k-1}, bias, out)
    #   x_i:  (C_i, t_hw)   child tile, channels on sublanes, spatial on lanes
    #   w_i:  (Cout, C_i)   BN-scale-folded 1x1 conv weight chunk
    #   bias: (Cout, 1)     folded BN bias = beta - mean * gamma / sqrt(var+eps)
    #   out:  (Cout, t_hw)
    x_refs = refs[:n_children]
    w_refs = refs[n_children:2 * n_children]
    bias_ref = refs[2 * n_children]
    o_ref = refs[2 * n_children + 1]

    # Split-concat 1x1 conv: accumulate per-child matmuls in f32.
    y = jnp.dot(w_refs[0][...], x_refs[0][...], preferred_element_type=jnp.float32)
    for i in range(1, n_children):
        y = y + jnp.dot(w_refs[i][...], x_refs[i][...],
                        preferred_element_type=jnp.float32)
    y = y + bias_ref[...]                                  # folded BN bias
    if residual:
        y = y + x_refs[0][...].astype(jnp.float32)         # reuse child-0 tile
    o_ref[...] = jnp.maximum(y, 0.0).astype(o_ref.dtype)


def _pick_spatial_tile(hw, cin, cout, itemsize, tile_budget_bytes=8 << 20,
                       lane_cap=2048):
    """Largest lane-dense (multiple-of-128) tile dividing hw within a VMEM budget."""
    if hw % 128 != 0:
        return hw  # full-extent block is always legal
    cap = (tile_budget_bytes // ((cin + cout) * itemsize)) // 128 * 128
    cap = max(128, min(cap, lane_cap, hw))
    t = (cap // 128) * 128
    while hw % t != 0:
        t -= 128
    return t


def root_forward(children_nchw, conv_w, gamma, beta, running_mean, running_var,
                 *, residual=True, eps=1e-5):
    """children_nchw: list of NCHW arrays. conv_w: (Cout, Cin, 1, 1) PyTorch layout."""
    n_children = len(children_nchw)
    N, _, H, W = children_nchw[0].shape
    HW = H * W
    Cout = conv_w.shape[0]
    c_sizes = [int(c.shape[1]) for c in children_nchw]
    Cin = sum(c_sizes)
    assert conv_w.shape[1] == Cin
    if residual:
        assert c_sizes[0] == Cout, "residual child must have out_channels channels"

    dtype = children_nchw[0].dtype
    itemsize = jnp.dtype(dtype).itemsize

    # ---- Fold BatchNorm (eval/running stats) into weight + bias ----
    scale = gamma / jnp.sqrt(running_var + eps)                     # (Cout,)
    bias = (beta - running_mean * scale).reshape(Cout, 1).astype(jnp.float32)
    w2d = conv_w.reshape(Cout, Cin).astype(jnp.float32) * scale[:, None]

    # Split weight per child along input channels (no channel concat needed).
    w_chunks = []
    off = 0
    for c in c_sizes:
        w_chunks.append(w2d[:, off:off + c])
        off += c

    # Flatten spatial only: (N, C_i, HW). No transposes, no copies of the data.
    xs = [child.reshape(N, csz, HW) for child, csz in zip(children_nchw, c_sizes)]

    t_hw = _pick_spatial_tile(HW, Cin, Cout, itemsize)
    grid = (N, HW // t_hw)

    in_specs = []
    for csz in c_sizes:
        in_specs.append(pl.BlockSpec((None, csz, t_hw), lambda n, j: (n, 0, j)))
    for csz in c_sizes:
        in_specs.append(pl.BlockSpec((Cout, csz), lambda n, j: (0, 0)))
    in_specs.append(pl.BlockSpec((Cout, 1), lambda n, j: (0, 0)))
    out_spec = pl.BlockSpec((None, Cout, t_hw), lambda n, j: (n, 0, j))

    # Advisory cost estimate for XLA scheduling around the call.
    bytes_accessed = (sum(csz * N * HW for csz in c_sizes) * itemsize    # inputs
                      + (Cout * Cin + Cout) * 4                          # weight+bias
                      + N * Cout * HW * itemsize)                        # output
    cost = pl.CostEstimate(flops=2 * N * HW * Cin * Cout,
                           transcendentals=0,
                           bytes_accessed=bytes_accessed)

    # VMEM limit: double-buffered in/out tiles + constants, clamped to be safe
    # on v7x (64 MiB physical) while leaving pipelining headroom.
    tile_bytes = (Cin + Cout) * t_hw * itemsize
    vmem_limit = min(48 << 20, max(16 << 20, 4 * tile_bytes + (2 << 20)))

    out = pl.pallas_call(
        functools.partial(_root_kernel, n_children=n_children, residual=residual),
        out_shape=jax.ShapeDtypeStruct((N, Cout, HW), dtype),
        grid_spec=pltpu.PrefetchScalarGridSpec(
            num_scalar_prefetch=0,
            grid=grid,
            in_specs=in_specs,
            out_specs=out_spec,
        ),
        compiler_params=pltpu.CompilerParams(
            dimension_semantics=("parallel", "parallel"),
            vmem_limit_bytes=vmem_limit),
        cost_estimate=cost,
    )(*xs, *w_chunks, bias)

    return out.reshape(N, Cout, H, W)


def _reference(children_nchw, conv_w, gamma, beta, mean, var, residual, eps=1e-5):
    x = jnp.concatenate(children_nchw, axis=1)                      # (N,Cin,H,W)
    w2d = conv_w.reshape(conv_w.shape[0], conv_w.shape[1])          # (Cout,Cin)
    y = jnp.einsum('nchw,oc->nohw', x, w2d)
    y = (y - mean[None, :, None, None]) / jnp.sqrt(var[None, :, None, None] + eps)
    y = y * gamma[None, :, None, None] + beta[None, :, None, None]
    if residual:
        y = y + children_nchw[0]
    return jnp.maximum(y, 0.0)


if __name__ == "__main__":
    key = jax.random.PRNGKey(0)
    k1, k2, k3 = jax.random.split(key, 3)

    # Root(in_channels=16, out_channels=8, kernel_size=1, residual=True)
    N, H, W = 2, 16, 16
    Cout = 8
    c0 = jax.random.normal(k1, (N, Cout, H, W), dtype=jnp.float32)  # children[0]
    c1 = jax.random.normal(k2, (N, 8, H, W), dtype=jnp.float32)     # children[1]
    Cin = Cout + 8

    conv_w = jax.random.normal(k3, (Cout, Cin, 1, 1), dtype=jnp.float32) * 0.1
    gamma = jnp.linspace(0.5, 1.5, Cout, dtype=jnp.float32)
    beta = jnp.linspace(-0.2, 0.2, Cout, dtype=jnp.float32)
    running_mean = jnp.linspace(-0.1, 0.1, Cout, dtype=jnp.float32)
    running_var = jnp.linspace(0.8, 1.2, Cout, dtype=jnp.float32)

    # residual=True path
    out = root_forward([c0, c1], conv_w, gamma, beta, running_mean, running_var,
                       residual=True)
    out = jax.block_until_ready(out)
    ref = _reference([c0, c1], conv_w, gamma, beta, running_mean, running_var,
                     residual=True)
    assert out.shape == (N, Cout, H, W)
    assert jnp.allclose(out, ref, atol=1e-4, rtol=1e-4)

    # residual=False path (no extra inputs are DMA'd in this configuration)
    out_nr = root_forward([c0, c1], conv_w, gamma, beta, running_mean, running_var,
                          residual=False)
    out_nr = jax.block_until_ready(out_nr)
    ref_nr = _reference([c0, c1], conv_w, gamma, beta, running_mean, running_var,
                        residual=False)
    assert jnp.allclose(out_nr, ref_nr, atol=1e-4, rtol=1e-4)

    print("KERNEL_OK")
</pallas_src>

<mosaic_0001>
module attributes {stable_mosaic.version = 11 : i64} {
  func.func @_root_kernel(%arg0: i32, %arg1: i32, %arg2: memref<1x8x256xf32, #tpu.memory_space<vmem>>, %arg3: memref<1x8x256xf32, #tpu.memory_space<vmem>>, %arg4: memref<8x8xf32, #tpu.memory_space<vmem>>, %arg5: memref<8x8xf32, #tpu.memory_space<vmem>>, %arg6: memref<8x1xf32, #tpu.memory_space<vmem>>, %arg7: memref<1x8x256xf32, #tpu.memory_space<vmem>>) attributes {dimension_semantics = [#tpu.dimension_semantics<parallel>, #tpu.dimension_semantics<parallel>], iteration_bounds = array<i64: 2, 1>, scalar_prefetch = 0 : i64, scratch_operands = 0 : i64, tpu.core_type = #tpu.core_type<tc>, window_params = [{transform_indices = @transform_0, window_bounds = array<i64: 1, 8, 256>}, {transform_indices = @transform_1, window_bounds = array<i64: 1, 8, 256>}, {pipeline_mode = #tpu.pipeline_mode<synchronous>, transform_indices = @transform_2, window_bounds = array<i64: 8, 8>}, {pipeline_mode = #tpu.pipeline_mode<synchronous>, transform_indices = @transform_3, window_bounds = array<i64: 8, 8>}, {pipeline_mode = #tpu.pipeline_mode<synchronous>, transform_indices = @transform_4, window_bounds = array<i64: 8, 1>}, {transform_indices = @transform_5, window_bounds = array<i64: 1, 8, 256>}]} {
    %c0 = arith.constant 0 : index
    %c0_0 = arith.constant 0 : index
    %0 = vector.load %arg4[%c0, %c0_0] : memref<8x8xf32, #tpu.memory_space<vmem>>, vector<8x8xf32>
    %c0_1 = arith.constant 0 : index
    %c0_2 = arith.constant 0 : index
    %c0_3 = arith.constant 0 : index
    %1 = vector.load %arg2[%c0_1, %c0_2, %c0_3] : memref<1x8x256xf32, #tpu.memory_space<vmem>>, vector<1x8x256xf32>
    %2 = vector.shape_cast %1 : vector<1x8x256xf32> to vector<8x256xf32>
    %cst = arith.constant dense<0.000000e+00> : vector<8x256xf32>
    %3 = tpu.matmul %0, %2, %cst {dimension_numbers = #tpu.dot_dimension_numbers<[1], [0], [0], [1], [0, 0, 1, 1], [], []>} : vector<8x8xf32>, vector<8x256xf32>, vector<8x256xf32> -> vector<8x256xf32>
    %c0_4 = arith.constant 0 : index
    %c0_5 = arith.constant 0 : index
    %4 = vector.load %arg5[%c0_4, %c0_5] : memref<8x8xf32, #tpu.memory_space<vmem>>, vector<8x8xf32>
    %c0_6 = arith.constant 0 : index
    %c0_7 = arith.constant 0 : index
    %c0_8 = arith.constant 0 : index
    %5 = vector.load %arg3[%c0_6, %c0_7, %c0_8] : memref<1x8x256xf32, #tpu.memory_space<vmem>>, vector<1x8x256xf32>
    %6 = vector.shape_cast %5 : vector<1x8x256xf32> to vector<8x256xf32>
    %cst_9 = arith.constant dense<0.000000e+00> : vector<8x256xf32>
    %7 = tpu.matmul %4, %6, %cst_9 {dimension_numbers = #tpu.dot_dimension_numbers<[1], [0], [0], [1], [0, 0, 1, 1], [], []>} : vector<8x8xf32>, vector<8x256xf32>, vector<8x256xf32> -> vector<8x256xf32>
    %8 = arith.addf %3, %7 : vector<8x256xf32>
    %c0_10 = arith.constant 0 : index
    %c0_11 = arith.constant 0 : index
    %9 = vector.load %arg6[%c0_10, %c0_11] : memref<8x1xf32, #tpu.memory_space<vmem>>, vector<8x1xf32>
    %10 = vector.broadcast %9 : vector<8x1xf32> to vector<8x256xf32>
    %11 = arith.addf %8, %10 : vector<8x256xf32>
    %c0_12 = arith.constant 0 : index
    %c0_13 = arith.constant 0 : index
    %c0_14 = arith.constant 0 : index
    %12 = vector.load %arg2[%c0_12, %c0_13, %c0_14] : memref<1x8x256xf32, #tpu.memory_space<vmem>>, vector<1x8x256xf32>
    %13 = vector.shape_cast %12 : vector<1x8x256xf32> to vector<8x256xf32>
    %14 = arith.addf %11, %13 : vector<8x256xf32>
    %cst_15 = arith.constant 0.000000e+00 : f32
    %15 = vector.broadcast %cst_15 : f32 to vector<8x256xf32>
    %16 = arith.maximumf %14, %15 : vector<8x256xf32>
    %c0_16 = arith.constant 0 : index
    %c0_17 = arith.constant 0 : index
    %c0_18 = arith.constant 0 : index
    %17 = vector.load %arg7[%c0_16, %c0_17, %c0_18] : memref<1x8x256xf32, #tpu.memory_space<vmem>>, vector<1x8x256xf32>
    %18 = vector.shape_cast %17 : vector<1x8x256xf32> to vector<8x256xf32>
    %19 = vector.shape_cast %16 : vector<8x256xf32> to vector<1x8x256xf32>
    tpu.vector_store %arg7[%c0_16, %c0_17, %c0_18], %19 {strides = array<i32>} : memref<1x8x256xf32, #tpu.memory_space<vmem>>, vector<1x8x256xf32>,
    return
  }
  func.func @transform_0(%arg0: i32, %arg1: i32) -> (i32, i32, i32) {
    %c0_i32 = arith.constant 0 : i32
    %c0_i32_0 = arith.constant 0 : i32
    return %arg0, %c0_i32, %arg1 : i32, i32, i32
  }
  func.func @transform_1(%arg0: i32, %arg1: i32) -> (i32, i32, i32) {
    %c0_i32 = arith.constant 0 : i32
    %c0_i32_0 = arith.constant 0 : i32
    return %arg0, %c0_i32, %arg1 : i32, i32, i32
  }
  func.func @transform_2(%arg0: i32, %arg1: i32) -> (i32, i32) {
    %c0_i32 = arith.constant 0 : i32
    %c0_i32_0 = arith.constant 0 : i32
    %c0_i32_1 = arith.constant 0 : i32
    return %c0_i32, %c0_i32_0 : i32, i32
  }
  func.func @transform_3(%arg0: i32, %arg1: i32) -> (i32, i32) {
    %c0_i32 = arith.constant 0 : i32
    %c0_i32_0 = arith.constant 0 : i32
    %c0_i32_1 = arith.constant 0 : i32
    return %c0_i32, %c0_i32_0 : i32, i32
  }
  func.func @transform_4(%arg0: i32, %arg1: i32) -> (i32, i32) {
    %c0_i32 = arith.constant 0 : i32
    %c0_i32_0 = arith.constant 0 : i32
    %c0_i32_1 = arith.constant 0 : i32
    return %c0_i32, %c0_i32_0 : i32, i32
  }
  func.func @transform_5(%arg0: i32, %arg1: i32) -> (i32, i32, i32) {
    %c0_i32 = arith.constant 0 : i32
    %c0_i32_0 = arith.constant 0 : i32
    return %arg0, %c0_i32, %arg1 : i32, i32, i32
  }
}

</mosaic_0001>

<bundles_post_ra>
// kernel: tpu_custom_call.1
= control target key start
LH: loop header
LB: loop body
LE: loop exit
PB: predicated region body
PF: predicated region fallthrough
CT: control target
= control target key end

     0   :  { %10 = vsyncpa [#allocation3], 0  ;;  %s1113_s0 = inlined_call_operand.hbm [shape: f32[2,8,256], index: 0, kind: input, shape index: {}]   ;;  %s1114_s1 = inlined_call_operand.hbm [shape: f32[2,8,256], index: 1, kind: input, shape index: {}]   ;;  %s1115_s2 = inlined_call_operand.vmem [shape: f32[8,8], index: 2, kind: input, shape index: {}]   ;;  %s1116_s3 = inlined_call_operand.vmem [shape: f32[8,8], index: 3, kind: input, shape index: {}]   ;;  %s1117_s4 = inlined_call_operand.vmem [shape: f32[8,1], index: 4, kind: input, shape index: {}]   ;;  %s1118_s5 = inlined_call_operand.hbm [shape: f32[2,8,256], index: 5, kind: output, shape index: {}]  }
   0x1   :  { %12 = vsyncpa [#allocation3 + $0x1], 0 }
   0x2   :  { %13 = vsyncpa [#allocation6], 0 }
   0x3   :  { %15 = vsyncpa [#allocation6 + $0x1], 0 }
   0x4   :  { %16 = vsyncpa [#allocation4], 0 }
   0x5   :  { %18 = vsyncpa [#allocation4 + $0x1], 0  ;;  %s879_s18 = smov 0   ;;  %s881_s19 = smov 0  }
   0x6   :  { %s883_s20 = smov 0   ;;  %s885_s21 = smov 0  }
   0x7   :  { %s887_s22 = smov 0   ;;  %s889_s23 = smov 0  }
   0x8 LB: > { %s600_s24 = sadd.s32 4294967295, %s842_s23   ;;  %s601_s25 = sadd.s32 4294967294, %s842_s23   ;;  %s842_s23 = sphi %s889_s23, %s24_s23   ;;  %s838_s22 = sphi %s887_s22, %s1138_s22   ;;  %s834_s21 = sphi %s885_s21, %s1137_s21   ;;  %s830_s20 = sphi %s883_s20, %s1136_s20   ;;  %s826_s19 = sphi %s881_s19, %s1135_s19   ;;  %s822_s18 = sphi %s879_s18, %s1134_s18  }
   0x9   : > { %s36_s26 = sadd.s32 1, %s838_s22  ;;  %s45_s27 = sadd.s32 1, %s830_s20 }
   0xa   : > { %p38_p0 = scmp.ge.s32.totalorder %s36_s26, 2  ;;  %p52_p1 = scmp.ne.s32.totalorder %s830_s20, %s826_s19 }
   0xb   : > { %p53_p2 = scmp.eq.s32.totalorder %s842_s23, 0  ;;  %p58_p3 = scmp.ne.s32.totalorder %s826_s19, %s822_s18 }
   0xc   : > { %s1140_s26 = smov (%p38_p0, %s36_s26), 0  ;;  %p59_p5 = scmp.eq.s32.totalorder %s600_s24, 0 }
   0xd   : > { %p920_p4 = por %p53_p2, %p52_p1  ;;  %s40_s29 = ssub.s32 %s838_s22, %s1140_s26 }
   0xe   : > { %p175_p6 = scmp.eq.s32.totalorder %s600_s24, 1  ;;  %p43_p7 = scmp.eq.s32.totalorder %s40_s29, 0 }
   0xf   : > { %p926_p8 = por %p59_p5, %p58_p3  ;;  %p181_p10 = scmp.eq.s32.totalorder %s601_s25, 1 }
  0x10   : > { %p930_p9 = por %p175_p6, %p52_p1  ;;  %p643_p13 = scmp.lt.s32.totalorder %s842_s23, 2 }
  0x11   : > { %s1122_s30 = scalar_select %p926_p8, 1, 0 }
  0x12   : > { %s1123_s6 = scalar_select %p930_p9, 1, 0 }
  0x13   : > { %s935_s7 = scalar_select %p43_p7, %s830_s20, %s45_s27  }
  0x14   : > { %p937_p11 = por %p181_p10, %p58_p3  ;;  %s944_s9 = sand.u32 1, %s830_s20  }
  0x15   : > { %s604_s10 = sshll.u32 %s944_s9, 4  ;;  %s621_s11 = sshll.u32 %s838_s22, 8 }
  0x16   : > { %s1124_s8 = scalar_select %p937_p11, 1, 0 }
  0x17   : > { %s953_s14 = scalar_lea.hbm %s1113_s0, %s621_s11  ;;  %s214_s15 = scalar_lea.vmem [#allocation2], %s604_s10 }
  0x18   : > { %s224_s16 = sshll.u32 %s214_s15, 4  ;;  %p961_p0 = pnand %p643_p13, %p920_p4  ;;  %s957_s16 = int_to_ptr.vmem [resolvable:$true] %s224_s16 }
  0x19   : > { %s211_s24 = scalar_lea.sflag [#allocation3], %s944_s9  ;;  %s696_s25 = scalar_lea.hbm %s953_s14, 256 }
  0x1a   : > { %p697_p3 = scmp.ne.s32.totalorder %s953_s14, %s696_s25  ;;  %p698_p5 = pneg %p961_p0 }
  0x1b   : > { %s701_s28 = scalar_lea.hbm %s1113_s0, 512  ;;  %p702_p4 = scmp.lt.u32.totalorder %s953_s14, %s1113_s0 }
  0x1c   : > { %p699_p6 = pnand %p698_p5, %p697_p3  ;;  %p703_p10 = scmp.lt.u32.totalorder %s701_s28, %s696_s25 }
  0x1d   : > { %p705_p12 = scmp.lt.u32.totalorder %s696_s25, %s953_s14 }
  0x1e   : > { %p700_p7 = pneg %p699_p6  ;;  %p704_p13 = por %p703_p10, %p702_p4 }
  0x20   : > { %p706_p1 = por %p705_p12, %p704_p13 }
  0x22   : > { %p707_p2 = pnand %p706_p1, %p700_p7 }
  0x24   : > { %710 = shalt.err (!%p707_p2)
}
  0x25   : > { %s711_s15 = scalar_lea.vmem %s957_s16, 256  ;;  %s844_s27 = smov [#allocation2]  }
  0x26   : > { %p712_p3 = scmp.ne.s32.totalorder %s957_s16, %s711_s15  ;;  %s716_s29 = sshll.u32 %s844_s27, 4  ;;  %s717_s29 = int_to_ptr.vmem [resolvable:$false] %s716_s29 }
  0x27   : > { %s718_s12 = scalar_lea.vmem %s717_s29, 512  ;;  %p719_p9 = scmp.lt.s32.totalorder %s957_s16, %s717_s29 }
  0x28   : > { %p714_p6 = pnand %p712_p3, %p698_p5  ;;  %p720_p4 = scmp.lt.s32.totalorder %s718_s12, %s711_s15 }
  0x2a   : > { %p715_p11 = pneg %p714_p6  ;;  %p721_p10 = por %p720_p4, %p719_p9 }
  0x2c   : > { %p722_p12 = pnand %p721_p10, %p715_p11 }
  0x2e   : > { %725 = shalt.err (!%p722_p12)
}
  0x2f   : > { %635 = dma.hbm_to_vmem [thread:$0]  (!%p961_p0), %s953_s14, 256, %s957_s16, %s211_s24  }
  0x30   : > { %p1126_p1 = scmp.lt.s32.totalorder %s842_s23, 3  ;;  %p1127_p2 = scmp.ge.s32.totalorder %s842_s23, 1 }
  0x31   : > { %s1006_s15 = scalar_lea.hbm %s1114_s1, %s621_s11  ;;  %s235_s27 = scalar_lea.vmem [#allocation5], %s604_s10 }
  0x32   : > { %p997_p7 = pnand %p1127_p2, %p1126_p1  ;;  %s245_s29 = sshll.u32 %s235_s27, 4  ;;  %s246_s29 = int_to_ptr.vmem [resolvable:$true] %s245_s29 }
  0x33   : > { %s232_s14 = scalar_lea.sflag [#allocation6], %s944_s9  ;;  %s726_s16 = scalar_lea.hbm %s1006_s15, 256 }
  0x34   : > { %s1128_s25 = scalar_select %p997_p7, 1, 0 }
  0x35   : > { %p727_p9 = scmp.ne.s32.totalorder %s1006_s15, %s726_s16  ;;  %s731_s11 = scalar_lea.hbm %s1114_s1, 512 }
  0x36   : > { %p732_p3 = scmp.lt.u32.totalorder %s1006_s15, %s1114_s1  ;;  %p733_p6 = scmp.lt.u32.totalorder %s731_s11, %s726_s16 }
  0x37   : > { %p729_p11 = pnand %p727_p9, %p698_p5  ;;  %p735_p10 = scmp.lt.u32.totalorder %s726_s16, %s1006_s15 }
  0x38   : > { %p734_p4 = por %p733_p6, %p732_p3 }
  0x39   : > { %p730_p13 = pneg %p729_p11 }
  0x3a   : > { %p736_p12 = por %p735_p10, %p734_p4 }
  0x3c   : > { %p737_p1 = pnand %p736_p12, %p730_p13 }
  0x3e   : > { %740 = shalt.err (!%p737_p1)
}
  0x3f   : > { %s741_s9 = scalar_lea.vmem %s246_s29, 256  ;;  %s845_s10 = smov [#allocation5]  }
  0x40   : > { %p742_p2 = scmp.ne.s32.totalorder %s246_s29, %s741_s9  ;;  %s746_s27 = sshll.u32 %s845_s10, 4  ;;  %s747_s27 = int_to_ptr.vmem [resolvable:$false] %s746_s27 }
  0x41   : > { %s748_s24 = scalar_lea.vmem %s747_s27, 512  ;;  %p749_p8 = scmp.lt.s32.totalorder %s246_s29, %s747_s27 }
  0x42   : > { %p744_p9 = pnand %p742_p2, %p698_p5  ;;  %p750_p7 = scmp.lt.s32.totalorder %s748_s24, %s741_s9 }
  0x44   : > { %p745_p11 = pneg %p744_p9  ;;  %p751_p3 = por %p750_p7, %p749_p8 }
  0x46   : > { %p752_p6 = pnand %p751_p3, %p745_p11 }
  0x48   : > { %755 = shalt.err (!%p752_p6)
}
  0x49   : > { %638 = dma.hbm_to_vmem [thread:$0]  (!%p961_p0), %s1006_s15, 256, %s246_s29, %s232_s14  }
  0x4a   : > { %p1129_p13 = scmp.ne.s32.totalorder %s1128_s25, 0 }
  0x4b   : > { %s1033_s16 = sand.u32 (!%p1129_p13), 1, %s826_s19   ;;  %p1130_p8 = scmp.ne.s32.totalorder (!%p1129_p13), %s1122_s30, 0 }
  0x4c   : > { %254 = sbr.rel (%p1129_p13) target bundleno = 326 (0x146), region = 40  ;;  %s1036_s12 = sshll.u32 (!%p1129_p13), %s1033_s16, 4 }
  0x4d   : > { %s257_s11 = scalar_lea.sflag (!%p1129_p13), [#allocation3], %s1033_s16  ;;  %s260_s28 = scalar_lea.vmem (!%p1129_p13), [#allocation2], %s1036_s12 }
  0x53   : > { %809 = dma.done.wait (%p1130_p8), %s257_s11, 256  }
  0x54   : > { %811 = vsyncadd (%p1130_p8), %s257_s11, 4294967040  ;;  %s266_s17 = scalar_lea.sflag [#allocation6], %s1033_s16  ;;  %s269_s25 = scalar_lea.vmem [#allocation5], %s1036_s12 }
  0x55   : > { %813 = dma.done.wait (%p1130_p8), %s266_s17, 256  }
  0x56   : > { %815 = vsyncadd (%p1130_p8), %s266_s17, 4294967040  ;;  %v846_v0 = vmov 0.0   ;;  %v847_v1 = vmov 0   ;;  %v309_v2 = vld [vmem:[%s269_s25 + $0x8] sm:$0xff]  ;;  %v308_v4 = vld [vmem:[%s269_s25] sm:$0xff]  ;;  %vm310_vm0 = vcmask 64512  }
  0x57   : > { %378 = vmatprep.mubr.f32.mxu1 %v846_v0  ;;  %452 = vmatprep.mubr.f32.mxu0 %v846_v0  ;;  %v306_v3 = vld [vmem:[%s260_s28 + $0x8] sm:$0xff]  ;;  %v305_v5 = vld [vmem:[%s260_s28] sm:$0xff]  ;;  %s623_s10 = sshll.u32 %s834_s21, 8  ;;  %s300_s27 = scalar_lea.vmem [#allocation7], %s1036_s12 }
  0x58   : > { %695 = vset.pattern.permute.xlu0 %v847_v1  ;;  %314 = vmatprep.subr.mxu1 %v309_v2  ;;  %v307_v6 = vld [vmem:[%s1116_s3] sm:$0xff]  ;;  %s490_s24 = sshll.u32 %s300_s27, 4  ;;  %s1064_s17 = scalar_lea.hbm %s1118_s5, %s623_s10  ;;  %s1066_s24 = int_to_ptr.vmem [resolvable:$true] %s490_s24 }
  0x59   : > { %388 = vmatprep.subr.mxu0 %v306_v3  ;;  %v304_v7 = vld [vmem:[%s1115_s2] sm:$0xff]  ;;  %315 = vmatpush1.msra.mxu1 %v308_v4  ;;  %s474_s25 = scalar_lea.sflag [#allocation4], %s1033_s16  ;;  %s756_s15 = scalar_lea.vmem %s1066_s24, 256 }
  0x5a   : > { %389 = vmatpush1.msra.mxu0 %v305_v5  ;;  %v459_v8 = vld [vmem:[%s1117_s4] sm:$0xff]  ;;  %614 = vmatmul.mubr.msk.f32.vlgmr.msra.gmra.mrb[0].mxu1 %vm310_vm0, %v307_v6  ;;  %p757_p0 = scmp.ne.s32.totalorder %s1066_s24, %s756_s15  ;;  %p1131_p5 = scmp.ne.s32.totalorder %s1123_s6, 0 }
  0x5b   : > { %615 = vmatmul.mubr.msk.f32.vlgmr.msra.gmra.mrb[0].mxu0 %vm310_vm0, %v304_v7  ;;  %462 = vperm.xlu0 %695, %v459_v8   ;;  %s848_s21 = smov [#allocation7]  }
  0x5c   : > { %p758_p7 = pnand %p757_p0, %p1131_p5  ;;  %s760_s12 = sshll.u32 %s848_s21, 4  ;;  %s761_s12 = int_to_ptr.vmem [resolvable:$false] %s760_s12 }
  0x5d   : > { %s762_s29 = scalar_lea.vmem %s761_s12, 512  ;;  %p763_p10 = scmp.lt.s32.totalorder %s1066_s24, %s761_s12 }
  0x5e   : > { %p759_p4 = pneg %p758_p7  ;;  %p764_p12 = scmp.lt.s32.totalorder %s762_s29, %s756_s15 }
  0x60   : > { %p765_p1 = por %p764_p12, %p763_p10 }
  0x62   : > { %p766_p2 = pnand %p765_p1, %p759_p4 }
  0xda   : > { %v463_v9 = vpop.permute.xlu0 %462 }
 0x12d   : > { %v380_v10 = vpop.f32.mrb[0].mxu1 }
 0x12e   : > { %v454_v11 = vpop.f32.mrb[0].mxu0  ;;  %v382_v13 = vpop.f32.mrb[1].mxu1 }
 0x12f   : > { %v455_v12 = vadd.f32 %v454_v11, %v380_v10  ;;  %v456_v14 = vpop.f32.mrb[1].mxu0 }
 0x130   : > { %v457_v15 = vadd.f32 %v456_v14, %v382_v13 }
 0x131   : > { %v465_v16 = vadd.f32 %v463_v9, %v455_v12 }
 0x132   : > { %v466_v17 = vadd.f32 %v463_v9, %v457_v15 }
 0x133   : > { %v467_v18 = vadd.f32 %v465_v16, %v305_v5 }
 0x134   : > { %v468_v19 = vadd.f32 %v466_v17, %v306_v3 }
 0x135   : > { %v469_v20 = vmax.f32 %v467_v18, 0.0 }
 0x136   : > { %v470_v21 = vmax.f32 %v468_v19, 0.0 }
 0x137   : > { %471 = vst [vmem:[%s300_s27] sm:$0xff] %v469_v20 }
 0x138   : > { %472 = vst [vmem:[%s300_s27 + $0x8] sm:$0xff] %v470_v21 }
 0x139   : > { %769 = shalt.err (!%p766_p2)
}
 0x13a   : > { %s770_s16 = scalar_lea.hbm %s1064_s17, 256  ;;  %s774_s30 = scalar_lea.hbm %s1118_s5, 512 }
 0x13b   : > { %p771_p9 = scmp.ne.s32.totalorder %s1064_s17, %s770_s16  ;;  %p775_p6 = scmp.lt.u32.totalorder %s1064_s17, %s1118_s5 }
 0x13c   : > { %p776_p13 = scmp.lt.u32.totalorder %s774_s30, %s770_s16  ;;  %p778_p0 = scmp.lt.u32.totalorder %s770_s16, %s1064_s17 }
 0x13d   : > { %p772_p11 = pnand %p771_p9, %p1131_p5 }
 0x13e   : > { %p777_p8 = por %p776_p13, %p775_p6 }
 0x13f   : > { %p773_p3 = pneg %p772_p11 }
 0x140   : > { %p779_p7 = por %p778_p0, %p777_p8 }
 0x142   : > { %p780_p4 = pnand %p779_p7, %p773_p3 }
 0x144   : > { %783 = shalt.err (!%p780_p4)
}
 0x145   : > { %630 = dma.vmem_to_hbm [thread:$0]  (%p1131_p5), %s1066_s24, 256, %s1064_s17, %s474_s25  }
 0x146 PF: > { %s502_s27 = sand.u32 1, %s822_s18   ;;  %p1132_p10 = scmp.ne.s32.totalorder %s1124_s8, 0 }
 0x147   : > { %p1133_p12 = scmp.ge.s32.totalorder %s842_s23, 2  ;;  %s503_s11 = scalar_lea.sflag [#allocation4], %s502_s27 }
 0x149   : > { %p640_p1 = pnand %p1133_p12, %p1132_p10 }
 0x14b   : > { %817 = dma.done.wait (!%p640_p1), %s503_s11, 256  }
 0x14c   : > { %819 = vsyncadd (!%p640_p1), %s503_s11, 4294967040  ;;  %s24_s23 = sadd.s32 1, %s842_s23   ;;  %s1134_s18 = smov %s826_s19 }
 0x14d   : > { %p21_p2 = scmp.ge.s32.totalorder %s24_s23, 4   ;;  %s1135_s19 = smov %s830_s20 }
 0x14e   : > { %s1136_s20 = smov %s935_s7  ;;  %s1137_s21 = smov %s838_s22 }
 0x14f   : > { %s1138_s22 = smov %s1140_s26  ;;  %23 = sbr.rel (!%p21_p2) target bundleno = 8 (0x8), region = 98 }
 0x156   :  { %508 = vsyncpa [#allocation3], 1 }
 0x157   :  { %510 = vsyncpa [#allocation3 + $0x1], 1 }
 0x158   :  { %511 = vsyncpa [#allocation6], 1 }
 0x159   :  { %513 = vsyncpa [#allocation6 + $0x1], 1 }
 0x15a   :  { %514 = vsyncpa [#allocation4], 1 }
 0x15b   :  { %516 = vsyncpa [#allocation4 + $0x1], 1 }

</bundles_post_ra>
